<compile_context>
chip_gen: v7x
topology: tpu7x:2x2x1
jax: 0.10.0
libtpu: 0.0.40
codegen_flags: <defaults>
</compile_context>

<pallas_src>
import functools

import jax
import jax.numpy as jnp
from jax.experimental import pallas as pl
from jax.experimental.pallas import tpu as pltpu


def _round_up(x, m):
    return ((x + m - 1) // m) * m


def _seq_attention_kernel(x_ref, w_ref, b_ref, v_ref, wsum_ref, weights_ref, *,
                          seq_len, matmul_dtype):
    TB, S_pad, D = x_ref.shape
    A_pad = w_ref.shape[1]

    x = x_ref[...]                                            # (TB, S_pad, D), input dtype

    # --- projection: one flattened (TB*S_pad, D) @ (D, A_pad) MXU matmul -------------
    # S_pad is a multiple of 8, so collapsing (TB, S_pad) is sublane-aligned (no relayout).
    x2 = x.reshape(TB * S_pad, D)
    if x2.dtype != matmul_dtype:
        x2 = x2.astype(matmul_dtype)
    h = jnp.tanh(
        jnp.dot(x2, w_ref[...], preferred_element_type=jnp.float32)
        + b_ref[...])                                         # (TB*S_pad, A_pad) f32

    # --- context-vector contraction (output width 1): VPU multiply + lane reduce ----
    # Zero-padded A columns of v contribute exactly 0.
    scores = jnp.sum(h.reshape(TB, S_pad, A_pad) * v_ref[...], axis=-1)   # (TB, S_pad) f32

    # --- numerically stable softmax over the sequence axis ---------------------------
    if seq_len != S_pad:
        seq_idx = jax.lax.broadcasted_iota(jnp.int32, (TB, S_pad), 1)
        scores = jnp.where(seq_idx < seq_len, scores, -jnp.inf)
    m = jnp.max(scores, axis=-1, keepdims=True)
    e = jnp.exp(scores - m)
    denom = jnp.sum(e, axis=-1, keepdims=True)
    inv = pl.reciprocal(denom, approx=True)                   # EUP slot (free-ish)
    inv = inv * (2.0 - denom * inv)                           # one Newton step -> full precision
    w = e * inv                                               # (TB, S_pad) f32

    weights_ref[...] = w.astype(weights_ref.dtype)

    # --- weighted sum over S: VPU multiply in the input dtype, accumulate in f32 ----
    # Padded sequence positions have weight exactly 0, so they contribute nothing.
    xw = x * w[:, :, None].astype(x.dtype)
    wsum_ref[...] = jnp.sum(xw.astype(jnp.float32), axis=1).astype(wsum_ref.dtype)


def _vmem_budgets():
    """Return (per-tile budget, vmem_limit cap) sized against the chip's physical VMEM."""
    try:
        cap = int(pltpu.get_tpu_info().vmem_capacity_bytes)
    except Exception:
        cap = 64 << 20                        # if the query fails, assume the smallest (v7x)
    if cap >= (96 << 20):                     # v5e / v6e: 128 MiB VMEM per core
        return 28 << 20, 64 << 20
    return 20 << 20, 40 << 20                 # v7x: 64 MiB VMEM per core


def seq_attention_layer(x, w_att, b_att, v, *, vmem_budget_bytes=None, matmul_dtype=None):
    """x: (B, S, D); w_att: (A, D) torch layout; b_att: (A,); v: (1, A) torch layout.

    Returns (weighted_sum (B, D), seq_weights (B, S)), both in x.dtype (matches torch).
    matmul_dtype: optional dtype for the MXU contraction (e.g. jnp.bfloat16 on v6e/v7x
    when bf16 precision of the tanh argument is acceptable); accumulation and all
    softmax / weighted-sum math stay in f32.
    """
    B, S, D = x.shape
    A = w_att.shape[0]

    mm_dtype = jnp.dtype(matmul_dtype) if matmul_dtype is not None else jnp.dtype(x.dtype)

    A_pad = _round_up(A, 128)                 # lane-dense h / params
    S_pad = _round_up(S, 8)                   # sublane-aligned only (NOT 128)

    # Parameters: pre-transpose + zero-pad to lane width (zero columns contribute 0).
    w_t = jnp.pad(jnp.asarray(w_att, mm_dtype).T, ((0, 0), (0, A_pad - A)))          # (D, A_pad)
    b_row = jnp.pad(jnp.asarray(b_att, jnp.float32).reshape(1, A),
                    ((0, 0), (0, A_pad - A)))                                         # (1, A_pad)
    v_row = jnp.pad(jnp.asarray(v, jnp.float32).reshape(1, A),
                    ((0, 0), (0, A_pad - A)))                                         # (1, A_pad)

    # Only a tiny (<=7 row) pad along S when S is not sublane-aligned; NO batch pad —
    # the ragged last batch block is handled by Pallas grid boundary semantics.
    x_p = x if S_pad == S else jnp.pad(x, ((0, 0), (0, S_pad - S), (0, 0)))

    budget, limit_cap = _vmem_budgets()
    if vmem_budget_bytes is not None:
        budget = int(vmem_budget_bytes)

    itemsize = jnp.dtype(x.dtype).itemsize
    per_b = (2 * S_pad * D * itemsize         # x tile, double-buffered input DMA
             + S_pad * A_pad * 4              # h intermediate (f32, single copy)
             + S_pad * D * 4                  # x*w product / f32 accumulation temp
             + 2 * (S_pad + D) * 4)           # outputs, double-buffered
    TB = max(1, budget // per_b)
    if TB >= B:
        TB = B
        if B >= 16:
            # keep >= 2 grid steps so dimension_semantics=("parallel",) can use both
            # TensorCores on v7x (harmless ~0.35us extra step on 1-TC chips).
            TB = min(B, _round_up(-(-B // 2), 8))
    else:
        # block second-to-last dims must be 8-aligned when they don't span the array
        TB = max(8, (TB // 8) * 8)
        # TODO(synk): chunk S inside the kernel if even TB=8 overshoots the VMEM budget
        #             (very large S*D); today we only rely on the raised vmem_limit.

    grid = (pl.cdiv(B, TB),)

    vmem_needed = (2 * TB * S_pad * D * itemsize
                   + TB * S_pad * A_pad * 4
                   + TB * S_pad * D * 4
                   + 2 * TB * (S_pad + D) * 4
                   + 2 * D * A_pad * jnp.dtype(mm_dtype).itemsize
                   + 4 * A_pad * 4)
    vmem_limit = int(min(max(2 * vmem_needed, 16 << 20), limit_cap))

    wsum, weights = pl.pallas_call(
        functools.partial(_seq_attention_kernel, seq_len=S, matmul_dtype=mm_dtype),
        out_shape=(
            jax.ShapeDtypeStruct((B, D), x.dtype),
            jax.ShapeDtypeStruct((B, S_pad), x.dtype),
        ),
        grid=grid,
        in_specs=[
            pl.BlockSpec((TB, S_pad, D), lambda i: (i, 0, 0)),
            pl.BlockSpec((D, A_pad), lambda i: (0, 0)),
            pl.BlockSpec((1, A_pad), lambda i: (0, 0)),
            pl.BlockSpec((1, A_pad), lambda i: (0, 0)),
        ],
        out_specs=(
            pl.BlockSpec((TB, D), lambda i: (i, 0)),
            pl.BlockSpec((TB, S_pad), lambda i: (i, 0)),
        ),
        compiler_params=pltpu.CompilerParams(
            dimension_semantics=("parallel",),
            vmem_limit_bytes=vmem_limit,
        ),
    )(x_p, w_t, b_row, v_row)

    return wsum, weights[:, :S]


def _reference(x, w_att, b_att, v):
    h = jnp.tanh(jnp.einsum('bsd,ad->bsa', x, w_att) + b_att)
    scores = jnp.einsum('bsa,a->bs', h, v[0])
    w = jax.nn.softmax(scores, axis=1)
    return jnp.einsum('bs,bsd->bd', w, x), w


if __name__ == "__main__":
    B, S, D, A = 2, 8, 32, 16   # batch, seq_len, input_dim, attention_size

    key = jax.random.PRNGKey(0)
    kx, kw, kb, kv = jax.random.split(key, 4)

    x = jax.random.normal(kx, (B, S, D), dtype=jnp.float32)
    # deterministic synthetic params with the nn.Linear shapes:
    w_att = jax.random.normal(kw, (A, D), dtype=jnp.float32) * 0.1   # seq_attention.weight
    b_att = jax.random.normal(kb, (A,), dtype=jnp.float32) * 0.1     # seq_attention.bias
    v = jax.random.normal(kv, (1, A), dtype=jnp.float32) * 0.1       # seq_context_vector.weight

    wsum, weights = seq_attention_layer(x, w_att, b_att, v)
    jax.block_until_ready((wsum, weights))

    ref_wsum, ref_w = _reference(x, w_att, b_att, v)
    assert wsum.shape == (B, D) and weights.shape == (B, S)
    assert jnp.allclose(weights, ref_w, atol=2e-5, rtol=1e-4), \
        float(jnp.max(jnp.abs(weights - ref_w)))
    assert jnp.allclose(wsum, ref_wsum, atol=1e-4, rtol=1e-4), \
        float(jnp.max(jnp.abs(wsum - ref_wsum)))

    print("KERNEL_OK")
</pallas_src>

<mosaic_0001>
module attributes {stable_mosaic.version = 11 : i64} {
  func.func @_seq_attention_kernel(%arg0: i32, %arg1: memref<2x8x32xf32, #tpu.memory_space<vmem>>, %arg2: memref<32x128xf32, #tpu.memory_space<vmem>>, %arg3: memref<1x128xf32, #tpu.memory_space<vmem>>, %arg4: memref<1x128xf32, #tpu.memory_space<vmem>>, %arg5: memref<2x32xf32, #tpu.memory_space<vmem>>, %arg6: memref<2x8xf32, #tpu.memory_space<vmem>>) attributes {dimension_semantics = [#tpu.dimension_semantics<parallel>], iteration_bounds = array<i64: 1>, scalar_prefetch = 0 : i64, scratch_operands = 0 : i64, tpu.core_type = #tpu.core_type<tc>, window_params = [{transform_indices = @transform_0, window_bounds = array<i64: 2, 8, 32>}, {pipeline_mode = #tpu.pipeline_mode<synchronous>, transform_indices = @transform_1, window_bounds = array<i64: 32, 128>}, {pipeline_mode = #tpu.pipeline_mode<synchronous>, transform_indices = @transform_2, window_bounds = array<i64: 1, 128>}, {pipeline_mode = #tpu.pipeline_mode<synchronous>, transform_indices = @transform_3, window_bounds = array<i64: 1, 128>}, {transform_indices = @transform_4, window_bounds = array<i64: 2, 32>}, {transform_indices = @transform_5, window_bounds = array<i64: 2, 8>}]} {
    %c0 = arith.constant 0 : index
    %c0_0 = arith.constant 0 : index
    %c0_1 = arith.constant 0 : index
    %0 = vector.load %arg1[%c0, %c0_0, %c0_1] : memref<2x8x32xf32, #tpu.memory_space<vmem>>, vector<2x8x32xf32>
    %1 = vector.shape_cast %0 : vector<2x8x32xf32> to vector<16x32xf32>
    %c0_2 = arith.constant 0 : index
    %c0_3 = arith.constant 0 : index
    %2 = vector.load %arg2[%c0_2, %c0_3] : memref<32x128xf32, #tpu.memory_space<vmem>>, vector<32x128xf32>
    %cst = arith.constant dense<0.000000e+00> : vector<16x128xf32>
    %3 = tpu.matmul %1, %2, %cst {dimension_numbers = #tpu.dot_dimension_numbers<[1], [0], [0], [1], [0, 0, 1, 1], [], []>} : vector<16x32xf32>, vector<32x128xf32>, vector<16x128xf32> -> vector<16x128xf32>
    %c0_4 = arith.constant 0 : index
    %c0_5 = arith.constant 0 : index
    %4 = vector.load %arg3[%c0_4, %c0_5] : memref<1x128xf32, #tpu.memory_space<vmem>>, vector<1x128xf32>
    %5 = vector.broadcast %4 : vector<1x128xf32> to vector<16x128xf32>
    %6 = arith.addf %3, %5 : vector<16x128xf32>
    %7 = math.tanh %6 : vector<16x128xf32>
    %8 = vector.shape_cast %7 : vector<16x128xf32> to vector<2x8x128xf32>
    %c0_6 = arith.constant 0 : index
    %c0_7 = arith.constant 0 : index
    %9 = vector.load %arg4[%c0_6, %c0_7] : memref<1x128xf32, #tpu.memory_space<vmem>>, vector<1x128xf32>
    %10 = vector.shape_cast %9 : vector<1x128xf32> to vector<1x1x128xf32>
    %11 = vector.broadcast %10 : vector<1x1x128xf32> to vector<2x8x128xf32>
    %12 = arith.mulf %8, %11 : vector<2x8x128xf32>
    %cst_8 = arith.constant dense<0.000000e+00> : vector<2x8xf32>
    %13 = vector.multi_reduction <add>, %12, %cst_8 [2] : vector<2x8x128xf32> to vector<2x8xf32>
    %cst_9 = arith.constant dense<0xFF800000> : vector<2xf32>
    %14 = vector.multi_reduction <maximumf>, %13, %cst_9 [1] : vector<2x8xf32> to vector<2xf32>
    %15 = vector.shape_cast %14 : vector<2xf32> to vector<2x1xf32>
    %16 = vector.broadcast %15 : vector<2x1xf32> to vector<2x8xf32>
    %17 = arith.subf %13, %16 : vector<2x8xf32>
    %18 = math.exp %17 : vector<2x8xf32>
    %cst_10 = arith.constant dense<0.000000e+00> : vector<2xf32>
    %19 = vector.multi_reduction <add>, %18, %cst_10 [1] : vector<2x8xf32> to vector<2xf32>
    %20 = vector.shape_cast %19 : vector<2xf32> to vector<2x1xf32>
    %21 = tpu.reciprocal %20 {approx = true} : vector<2x1xf32> -> vector<2x1xf32>
    %22 = arith.mulf %20, %21 : vector<2x1xf32>
    %cst_11 = arith.constant 2.000000e+00 : f32
    %23 = vector.broadcast %cst_11 : f32 to vector<2x1xf32>
    %24 = arith.subf %23, %22 : vector<2x1xf32>
    %25 = arith.mulf %21, %24 : vector<2x1xf32>
    %26 = vector.broadcast %25 : vector<2x1xf32> to vector<2x8xf32>
    %27 = arith.mulf %18, %26 : vector<2x8xf32>
    %c0_12 = arith.constant 0 : index
    %c0_13 = arith.constant 0 : index
    %28 = vector.load %arg6[%c0_12, %c0_13] : memref<2x8xf32, #tpu.memory_space<vmem>>, vector<2x8xf32>
    tpu.vector_store %arg6[%c0_12, %c0_13], %27 {strides = array<i32>} : memref<2x8xf32, #tpu.memory_space<vmem>>, vector<2x8xf32>,
    %29 = vector.shape_cast %27 : vector<2x8xf32> to vector<2x8x1xf32>
    %30 = vector.broadcast %29 : vector<2x8x1xf32> to vector<2x8x32xf32>
    %31 = arith.mulf %0, %30 : vector<2x8x32xf32>
    %cst_14 = arith.constant dense<0.000000e+00> : vector<2x32xf32>
    %32 = vector.multi_reduction <add>, %31, %cst_14 [1] : vector<2x8x32xf32> to vector<2x32xf32>
    %c0_15 = arith.constant 0 : index
    %c0_16 = arith.constant 0 : index
    %33 = vector.load %arg5[%c0_15, %c0_16] : memref<2x32xf32, #tpu.memory_space<vmem>>, vector<2x32xf32>
    tpu.vector_store %arg5[%c0_15, %c0_16], %32 {strides = array<i32>} : memref<2x32xf32, #tpu.memory_space<vmem>>, vector<2x32xf32>,
    return
  }
  func.func @transform_0(%arg0: i32) -> (i32, i32, i32) {
    %c0_i32 = arith.constant 0 : i32
    %c0_i32_0 = arith.constant 0 : i32
    %c0_i32_1 = arith.constant 0 : i32
    return %arg0, %c0_i32, %c0_i32_0 : i32, i32, i32
  }
  func.func @transform_1(%arg0: i32) -> (i32, i32) {
    %c0_i32 = arith.constant 0 : i32
    %c0_i32_0 = arith.constant 0 : i32
    %c0_i32_1 = arith.constant 0 : i32
    return %c0_i32, %c0_i32_0 : i32, i32
  }
  func.func @transform_2(%arg0: i32) -> (i32, i32) {
    %c0_i32 = arith.constant 0 : i32
    %c0_i32_0 = arith.constant 0 : i32
    %c0_i32_1 = arith.constant 0 : i32
    return %c0_i32, %c0_i32_0 : i32, i32
  }
  func.func @transform_3(%arg0: i32) -> (i32, i32) {
    %c0_i32 = arith.constant 0 : i32
    %c0_i32_0 = arith.constant 0 : i32
    %c0_i32_1 = arith.constant 0 : i32
    return %c0_i32, %c0_i32_0 : i32, i32
  }
  func.func @transform_4(%arg0: i32) -> (i32, i32) {
    %c0_i32 = arith.constant 0 : i32
    %c0_i32_0 = arith.constant 0 : i32
    return %arg0, %c0_i32 : i32, i32
  }
  func.func @transform_5(%arg0: i32) -> (i32, i32) {
    %c0_i32 = arith.constant 0 : i32
    %c0_i32_0 = arith.constant 0 : i32
    return %arg0, %c0_i32 : i32, i32
  }
}

</mosaic_0001>

<bundles_post_ra>
// kernel: tpu_custom_call.1
= control target key start
LH: loop header
LB: loop body
LE: loop exit
PB: predicated region body
PF: predicated region fallthrough
CT: control target
= control target key end

     0   :  { %11 = vsyncpa [#allocation3], 0  ;;  %s560_s0 = inlined_call_operand.hbm [shape: f32[2,8,32], index: 0, kind: input, shape index: {}]   ;;  %s561_s1 = inlined_call_operand.hbm [shape: f32[32,128], index: 1, kind: input, shape index: {}]   ;;  %s562_s2 = inlined_call_operand.vmem [shape: f32[1,128], index: 2, kind: input, shape index: {}]   ;;  %s563_s3 = inlined_call_operand.vmem [shape: f32[1,128], index: 3, kind: input, shape index: {}]   ;;  %s564_s4 = inlined_call_operand.hbm [shape: f32[2,32], index: 4, kind: output, shape index: {0}]   ;;  %s565_s5 = inlined_call_operand.hbm [shape: f32[2,8], index: 5, kind: output, shape index: {1}]  }
   0x1   :  { %12 = vsyncpa [#allocation6], 0 }
   0x2   :  { %13 = vsyncpa [#allocation4], 0 }
   0x3   :  { %14 = vsyncpa [#allocation9], 0  ;;  %s450_s18 = smov [#allocation2]   ;;  %s354_s22 = scalar_lea.hbm %s560_s0, 256 }
   0x4   :  { %s20_s19 = sshll.u32 %s450_s18, 4  ;;  %p355_p0 = scmp.ne.s32.totalorder %s560_s0, %s354_s22  ;;  %s21_s19 = int_to_ptr.vmem [resolvable:$true] %s20_s19 }
   0x5   :  { %p358_p1 = scmp.lt.u32.totalorder %s354_s22, %s560_s0 }
   0x7   :  { %p360_p2 = pnand %p358_p1, %p355_p0 }
   0x9   :  { %363 = shalt.err (!%p360_p2)
}
   0xa   :  { %s364_s27 = scalar_lea.vmem %s21_s19, 256  ;;  %p369_p4 = scmp.lt.s32.totalorder %s21_s19, %s21_s19 }
   0xb   :  { %p365_p3 = scmp.ne.s32.totalorder %s21_s19, %s364_s27  ;;  %p370_p5 = scmp.lt.s32.totalorder %s364_s27, %s364_s27 }
   0xd   :  { %p371_p6 = por %p370_p5, %p369_p4 }
   0xf   :  { %p372_p7 = pnand %p371_p6, %p365_p3 }
  0x11   :  { %375 = shalt.err (!%p372_p7)
}
  0x12   :  { %s451_s28 = smov 128   ;;  %s452_s29 = smov 8  }
  0x13   :  { %26 = dma.hbm_to_vmem [thread:$0]  %s560_s0, 256, %s21_s19, [#allocation3], %s451_s28, %s451_s28, %s452_s29  }
  0x14   :  { %s453_s7 = smov [#allocation5]   ;;  %s376_s11 = scalar_lea.hbm %s561_s1, 512 }
  0x15   :  { %s32_s8 = sshll.u32 %s453_s7, 4  ;;  %p377_p8 = scmp.ne.s32.totalorder %s561_s1, %s376_s11  ;;  %s33_s8 = int_to_ptr.vmem [resolvable:$true] %s32_s8 }
  0x16   :  { %p380_p9 = scmp.lt.u32.totalorder %s376_s11, %s561_s1 }
  0x18   :  { %p382_p10 = pnand %p380_p9, %p377_p8 }
  0x1a   :  { %385 = shalt.err (!%p382_p10)
}
  0x1b   :  { %s386_s16 = scalar_lea.vmem %s33_s8, 512  ;;  %p391_p12 = scmp.lt.s32.totalorder %s33_s8, %s33_s8 }
  0x1c   :  { %p387_p11 = scmp.ne.s32.totalorder %s33_s8, %s386_s16  ;;  %p392_p13 = scmp.lt.s32.totalorder %s386_s16, %s386_s16 }
  0x1e   :  { %p393_p0 = por %p392_p13, %p391_p12 }
  0x20   :  { %p394_p1 = pnand %p393_p0, %p387_p11 }
  0x22   :  { %397 = shalt.err (!%p394_p1)
}
  0x23   :  { %38 = dma.hbm_to_vmem [thread:$0]  %s561_s1, 512, %s33_s8, [#allocation6], %s451_s28, %s451_s28, %s452_s29  }
  0x24   :  { %442 = dma.done.wait [#allocation3], 256  }
  0x25   :  { %443 = vsyncadd [#allocation3], 4294967040 }
  0x26   :  { %444 = dma.done.wait [#allocation6], 512  }
  0x27   :  { %445 = vsyncadd [#allocation6], 4294966784  ;;  %vm62_vm0 = vcmask 261120   ;;  %v51_v0 = vld [vmem:[#allocation5] sm:$0xff]  ;;  %v52_v1 = vld [vmem:[#allocation5 + $0x8] sm:$0xff]  ;;  %v161_v18 = vlaneseq  ;;  %vm171_vm1 = vcmask 1041409  }
  0x28   :  { %v53_v2 = vld [vmem:[#allocation5 + $0x10] sm:$0xff]  ;;  %v327_v3 = vpack.c.bf16 %v52_v1, %v51_v0  ;;  %v54_v4 = vld [vmem:[#allocation5 + $0x18] sm:$0xff]  ;;  %vm174_vm2 = vcmask 58368   ;;  %v454_v28 = vmov 0  }
  0x29   :  { %v511_v5 = vld [vmem:[#allocation2] sm:$0xff]  ;;  %v331_v6 = vpack.c.bf16 %v54_v4, %v53_v2  ;;  %v515_v7 = vld [vmem:[#allocation2 + $0x8] sm:$0xff]  ;;  %v162_v19 = vand.u32 127, %v161_v18  ;;  %v164_v20 = vshrl.u32 %v161_v18, 7  ;;  %343 = vset.pattern.permute.xlu0 %v454_v28  ;;  %342 = vset.pattern.permute.xlu1 %v454_v28 }
  0x2a   :  { %324 = vmatprep.mubr.msk.f32.mxu0 %vm62_vm0, %v511_v5  ;;  %328 = vmatprep.subr.bf16.mxu0 %v327_v3  ;;  %v306_v8 = vld [vmem:[%s562_s2] ss:$0 sm:$0xff]  ;;  %s455_s2 = smov [#allocation8]  }
  0x2b   :  { %330 = vmatpush3.bf16.msra.mxu0 %v327_v3  ;;  %v309_v13 = vld [vmem:[%s563_s3] ss:$0 sm:$0xff]  ;;  %v165_v22 = vsub.s32 %v162_v19, %v164_v20  ;;  %v181_v29 = vsub.s32 0, %v164_v20  ;;  %v185_v30 = vsub.s32 1, %v164_v20  ;;  %s292_s3 = sshll.u32 %s455_s2, 4  ;;  %s293_s3 = int_to_ptr.vmem [resolvable:$true] %s292_s3 }
  0x2c   :  { %332 = vmatprep.subr.bf16.mxu0 %v331_v6  ;;  %s398_s21 = scalar_lea.vmem %s293_s3, 32  ;;  %p403_p3 = scmp.lt.s32.totalorder %s293_s3, %s293_s3 }
  0x2d   :  { %p399_p2 = scmp.ne.s32.totalorder %s293_s3, %s398_s21  ;;  %p404_p4 = scmp.lt.s32.totalorder %s398_s21, %s398_s21 }
  0x2f   :  { %334 = vmatpush3.bf16.msra.mxu0 %v331_v6  ;;  %p405_p5 = por %p404_p4, %p403_p3 }
  0x31   :  { %p406_p6 = pnand %p405_p5, %p399_p2 }
  0x32   :  { %325 = vmatmul.mubr.msk.f32.vlgmr.msra.gmra.mrb[0].mxu0 %vm62_vm0, %v515_v7 }
 0x105   :  { %v326_v9 = vpop.f32.mrb[0].mxu0 }
 0x106   :  { %v135_v10 = vpop.f32.mrb[1].mxu0  ;;  %v141_v11 = vadd.f32 %v326_v9, %v306_v8 }
 0x107   :  { %v136_v12 = vadd.f32 %v306_v8, %v135_v10 }
 0x109   :  { %344 = vtanh.f32 %v136_v12 }
 0x10a   :  { %346 = vtanh.f32 %v141_v11 }
 0x113   :  { %v345_v14 = vpop.eup %344 }
 0x114   :  { %v153_v15 = vmul.f32 %v345_v14, %v309_v13  ;;  %v347_v16 = vpop.eup %346 }
 0x115   :  { %v154_v17 = vmul.f32 %v347_v16, %v309_v13 }
 0x116   :  { %155 = vadd.xlane.f32.xlu0 %v153_v15 }
 0x11a   :  { %157 = vadd.xlane.f32.xlu0 %v154_v17 }
 0x1a3   :  { %v156_v21 = vpop.xlane.xlu0 %155 }
 0x1a4   :  { %v166_v24 = vrot.slane %v156_v21, %v165_v22 }
 0x1a7   :  { %v158_v23 = vpop.xlane.xlu0 %157 }
 0x1a8   :  { %v170_v25 = vrot.slane %v158_v23, %v165_v22 }
 0x1aa   :  { %v172_v26 = vsel %vm171_vm1, %v170_v25, %v166_v24 }
 0x1ab   :  { %v175_v27 = vsel %vm174_vm2, %v172_v26, -inf }
 0x1ac   :  { %176 = vmax.xlane.f32.xlu1 %v175_v27 }
 0x239   :  { %v177_v31 = vpop.xlane.xlu1 %176 }
 0x23a   :  { %v182_v32 = vrot.slane %v177_v31, %v181_v29  ;;  %v186_v33 = vrot.slane %v177_v31, %v185_v30 }
 0x23c   :  { %v189_v34 = vsub.f32 %v156_v21, %v182_v32  ;;  %v190_v35 = vsub.f32 %v158_v23, %v186_v33 }
 0x23e   :  { %v191_v36 = vmul.f32 1.442695, %v189_v34  ;;  %v193_v37 = vmul.f32 1.442695, %v190_v35 }
 0x240   :  { %348 = vpow2.f32 %v191_v36 }
 0x241   :  { %350 = vpow2.f32 %v193_v37 }
 0x24a   :  { %v349_v38 = vpop.eup %348 }
 0x24b   :  { %v351_v39 = vpop.eup %350  ;;  %198 = vperm.xlu1 %342, %v349_v38  }
 0x24c   :  { %201 = vperm.xlu0 %343, %v351_v39  }
 0x2ca   :  { %v199_v40 = vpop.permute.xlu1 %198 }
 0x2cb   :  { %v202_v41 = vpop.permute.xlu0 %201  ;;  %v206_v42 = vrot.slane %v199_v40, %v165_v22 }
 0x2cc   :  { %v210_v43 = vrot.slane %v202_v41, %v165_v22 }
 0x2ce   :  { %v211_v44 = vsel %vm171_vm1, %v210_v43, %v206_v42 }
 0x2cf   :  { %v213_v45 = vsel %vm174_vm2, %v211_v44, 0.0 }
 0x2d0   :  { %214 = vadd.xlane.f32.xlu1 %v213_v45 }
 0x35d   :  { %v215_v46 = vpop.xlane.xlu1 %214 }
 0x35e   :  { %352 = vrcp.f32 %v215_v46 }
 0x368   :  { %v353_v47 = vpop.eup %352 }
 0x369   :  { %v217_v48 = vmul.f32 %v353_v47, %v215_v46 }
 0x36b   :  { %v218_v49 = vsub.f32 2.0, %v217_v48 }
 0x36d   :  { %v219_v50 = vmul.f32 %v353_v47, %v218_v49 }
 0x36f   :  { %v224_v51 = vrot.slane %v219_v50, %v181_v29  ;;  %v228_v52 = vrot.slane %v219_v50, %v185_v30 }
 0x371   :  { %v231_v53 = vmul.f32 %v349_v38, %v224_v51  ;;  %v232_v54 = vmul.f32 %v351_v39, %v228_v52 }
 0x373   :  { %236 = vperm.xlu0 %343, %v231_v53  }
 0x377   :  { %239 = vperm.xlu0 %343, %v232_v54  }
 0x3f2   :  { %v237_v55 = vpop.permute.xlu0 %236 }
 0x3f3   :  { %v254_v56 = vmul.f32 %v237_v55, %v511_v5  ;;  %v244_v60 = vrot.slane %v237_v55, %v165_v22 }
 0x3f5   :  { %v256_v57 = vsel %vm62_vm0, %v254_v56, 0.0 }
 0x3f6   :  { %v257_v58 = vrot.slane %v256_v57, 4  ;;  %v240_v59 = vpop.permute.xlu0 %239 }
 0x3f7   :  { %v248_v61 = vrot.slane %v240_v59, %v165_v22  ;;  %v255_v62 = vmul.f32 %v240_v59, %v515_v7 }
 0x3f8   :  { %v258_v63 = vadd.f32 %v257_v58, %v256_v57 }
 0x3f9   :  { %v263_v0 = vsel %vm62_vm0, %v255_v62, 0.0  ;;  %v249_v1 = vsel %vm171_vm1, %v248_v61, %v244_v60 }
 0x3fa   :  { %v259_v2 = vrot.slane %v258_v63, 2  ;;  %v264_v3 = vrot.slane %v263_v0, 4  ;;  %251 = vst.msk [vmem:[#allocation8] sm:$0x3] %vm174_vm2, %v249_v1 }
 0x3fb   :  { %409 = shalt.err (!%p406_p6)
}
 0x3fc   :  { %s410_s24 = scalar_lea.hbm %s565_s5, 32 }
 0x3fd   :  { %p411_p7 = scmp.ne.s32.totalorder %s565_s5, %s410_s24  ;;  %p414_p8 = scmp.lt.u32.totalorder %s410_s24, %s565_s5 }
 0x3ff   :  { %p416_p9 = pnand %p414_p8, %p411_p7 }
 0x401   :  { %419 = shalt.err (!%p416_p9)
}
 0x402   :  { %295 = dma.vmem_to_hbm [thread:$0]  %s293_s3, 32, %s565_s5, [#allocation9]   ;;  %v260_v4 = vadd.f32 %v259_v2, %v258_v63  ;;  %v265_v5 = vadd.f32 %v264_v3, %v263_v0  ;;  %vm274_vm3 = vcmask 254976  }
 0x403   :  { %s456_s6 = smov [#allocation7]  }
 0x404   :  { %v266_v6 = vrot.slane %v265_v5, 2  ;;  %v261_v7 = vrot.slane %v260_v4, 1  ;;  %s282_s7 = sshll.u32 %s456_s6, 4  ;;  %s283_s7 = int_to_ptr.vmem [resolvable:$true] %s282_s7 }
 0x405   :  { %s420_s8 = scalar_lea.vmem %s283_s7, 32  ;;  %p425_p11 = scmp.lt.s32.totalorder %s283_s7, %s283_s7 }
 0x406   :  { %v267_v8 = vadd.f32 %v266_v6, %v265_v5  ;;  %v262_v11 = vadd.f32 %v261_v7, %v260_v4  ;;  %p421_p10 = scmp.ne.s32.totalorder %s283_s7, %s420_s8  ;;  %p426_p12 = scmp.lt.s32.totalorder %s420_s8, %s420_s8 }
 0x408   :  { %v268_v9 = vrot.slane %v267_v8, 1  ;;  %p427_p13 = por %p426_p12, %p425_p11 }
 0x40a   :  { %v269_v10 = vadd.f32 %v268_v9, %v267_v8  ;;  %p428_p0 = pnand %p427_p13, %p421_p10 }
 0x40c   :  { %v272_v12 = vsel %vm171_vm1, %v269_v10, %v262_v11 }
 0x40d   :  { %275 = vst.msk [vmem:[#allocation7] sm:$0x3] %vm274_vm3, %v272_v12 }
 0x40e   :  { %431 = shalt.err (!%p428_p0)
}
 0x40f   :  { %s432_s10 = scalar_lea.hbm %s564_s4, 32 }
 0x410   :  { %p433_p1 = scmp.ne.s32.totalorder %s564_s4, %s432_s10  ;;  %p436_p2 = scmp.lt.u32.totalorder %s432_s10, %s564_s4 }
 0x412   :  { %p438_p3 = pnand %p436_p2, %p433_p1 }
 0x414   :  { %441 = shalt.err (!%p438_p3)
}
 0x415   :  { %285 = dma.vmem_to_hbm [thread:$0]  %s283_s7, 32, %s564_s4, [#allocation4]  }
 0x416   :  { %446 = dma.done.wait [#allocation4], 32  }
 0x417   :  { %447 = vsyncadd [#allocation4], 4294967264 }
 0x418   :  { %448 = dma.done.wait [#allocation9], 32  }
 0x419   :  { %449 = vsyncadd [#allocation9], 4294967264 }
 0x41a   :  { %302 = vsyncpa [#allocation3], 1 }
 0x41b   :  { %303 = vsyncpa [#allocation6], 1 }
 0x41c   :  { %304 = vsyncpa [#allocation4], 1 }
 0x41d   :  { %305 = vsyncpa [#allocation9], 1 }

</bundles_post_ra>
